<compile_context>
chip_gen: v6e
topology: v6e:2x2x1
jax: 0.10.0
libtpu: 0.0.40
codegen_flags: <defaults>
</compile_context>

<pallas_src>
import numpy as np
import jax
import jax.numpy as jnp
from jax.experimental import pallas as pl
from jax.experimental.pallas import tpu as pltpu

NUM_CLASSES = 3
CLASS_PAD = 128  # lane-dense output width (classes live in lanes 0..2)
LANE = 128


def _round_up(x, m):
    return ((x + m - 1) // m) * m


# --------------------------------------------------------------------------- #
# Kernel: the whole ensemble in three matmuls, per batch tile.
# --------------------------------------------------------------------------- #
def gbt_kernel(x_ref, a_ref, thr_ref, ct_ref, d_ref, e_ref, out_ref):
    x = x_ref[...]                                                    # [bt, F]
    s = jnp.dot(x, a_ref[...], preferred_element_type=jnp.float32)   # [bt, TIp]
    cond = (s <= thr_ref[...]).astype(jnp.float32)                   # [bt, TIp]
    path = jnp.dot(cond, ct_ref[...],
                   preferred_element_type=jnp.float32)               # [bt, TLp]
    # path is integer-valued f32; leaf hit <=> path reaches its max D.
    leaf = (path > d_ref[...] - 0.5).astype(jnp.float32)             # [bt, TLp]
    out_ref[...] = jnp.dot(leaf, e_ref[...],
                           preferred_element_type=jnp.float32)       # [bt, 128]


def gbt_forward(x, A_flat, thr, Ct_big, D_flat, E_pad, *, batch_tile=256):
    batch, F = x.shape
    TI = A_flat.shape[1]
    TL = Ct_big.shape[1]
    CP = E_pad.shape[1]

    bt = min(batch_tile, _round_up(batch, 8))
    padded = _round_up(batch, bt)
    if padded != batch:
        x = jnp.pad(x, ((0, padded - batch), (0, 0)))

    out = pl.pallas_call(
        gbt_kernel,
        out_shape=jax.ShapeDtypeStruct((padded, CP), jnp.float32),
        grid_spec=pltpu.PrefetchScalarGridSpec(
            num_scalar_prefetch=0,
            grid=(padded // bt,),
            in_specs=[
                pl.BlockSpec((bt, F), lambda i: (i, 0)),     # x batch tile
                pl.BlockSpec((F, TI), lambda i: (0, 0)),     # A_flat (resident)
                pl.BlockSpec((1, TI), lambda i: (0, 0)),     # thresholds
                pl.BlockSpec((TI, TL), lambda i: (0, 0)),    # block-diag C^T
                pl.BlockSpec((1, TL), lambda i: (0, 0)),     # D (left-edge counts)
                pl.BlockSpec((TL, CP), lambda i: (0, 0)),    # E_big (class-padded)
            ],
            out_specs=pl.BlockSpec((bt, CP), lambda i: (i, 0)),
        ),
        compiler_params=pltpu.CompilerParams(
            dimension_semantics=("parallel",),
        ),
    )(x, A_flat, thr, Ct_big, D_flat, E_pad)

    return out[:batch, :NUM_CLASSES]


# --------------------------------------------------------------------------- #
# Host-side fusion of the per-bundle tree parameters (lane-dense padded).
# --------------------------------------------------------------------------- #
def build_fused_params(A, B, E, Ct, D_row):
    """A:[NB,3,F,I] B:[NB,3,I] E:[NB,3,L,1] Ct:[I,L] D_row:[1,L] ->
       A_flat [F,TIp], thr [1,TIp], Ct_big [TIp,TLp], D_flat [1,TLp], E_pad [TLp,128]
       with TIp/TLp rounded up to multiples of 128 for lane-dense MXU operands."""
    NB, C, F, I = A.shape
    L = Ct.shape[1]
    T = NB * C  # total trees, ordered t = b*C + c

    TI, TL = T * I, T * L
    TIp, TLp = _round_up(TI, LANE), _round_up(TL, LANE)

    A_flat = jnp.transpose(A, (2, 0, 1, 3)).reshape(F, TI)
    A_flat = jnp.pad(A_flat, ((0, 0), (0, TIp - TI)))             # zero cols -> s=0

    thr = B.reshape(1, TI)
    thr = jnp.pad(thr, ((0, 0), (0, TIp - TI)),
                  constant_values=-1e9)                            # cond=0 on pad

    Ct_big = jnp.kron(jnp.eye(T, dtype=jnp.float32), Ct)          # [TI, TL]
    Ct_big = jnp.pad(Ct_big, ((0, TIp - TI), (0, TLp - TL)))       # zero rows/cols

    D_flat = jnp.tile(D_row, (1, T))                               # [1, TL]
    D_flat = jnp.pad(D_flat, ((0, 0), (0, TLp - TL)),
                     constant_values=1e9)                          # leaf=0 on pad

    e = E[..., 0]                                                  # [NB, 3, L]
    eye = jnp.eye(NUM_CLASSES, dtype=jnp.float32)
    E_big = (e[..., None] * eye[None, :, None, :]).reshape(TL, NUM_CLASSES)
    E_pad = jnp.pad(E_big, ((0, TLp - TL), (0, CLASS_PAD - NUM_CLASSES)))
    return A_flat, thr, Ct_big, D_flat, E_pad


# --------------------------------------------------------------------------- #
# Pure-JAX reference mirroring the PyTorch forward (per-bundle, per-class).
# --------------------------------------------------------------------------- #
def gbt_reference(x, A, B, E, Ct, D_row):
    NB = A.shape[0]
    out = jnp.zeros((x.shape[0], NUM_CLASSES), jnp.float32)
    for b in range(NB):
        preds = []
        for c in range(NUM_CLASSES):
            s = x @ A[b, c]
            cond = (s <= B[b, c][None, :]).astype(jnp.float32)
            path = cond @ Ct
            leaf = (path == D_row).astype(jnp.float32)
            preds.append(leaf @ E[b, c])
        out = out + jnp.concatenate(preds, axis=1)
    return out


def build_tree_paths(depth):
    """Complete binary tree: C [L, I] with +1 left / -1 right edges, D [L] = #left."""
    I = 2 ** depth - 1
    L = 2 ** depth
    C = np.zeros((L, I), dtype=np.float32)
    D = np.zeros((L,), dtype=np.float32)
    for l in range(L):
        node = 0
        for k in range(depth):
            go_right = (l >> (depth - 1 - k)) & 1
            if go_right == 0:
                C[l, node] = 1.0
                D[l] += 1.0
                node = 2 * node + 1
            else:
                C[l, node] = -1.0
                node = 2 * node + 2
    return C, D


if __name__ == "__main__":
    batch = 8          # samples
    F = 16             # number of input features (X_train.shape[1:])
    depth = 3
    I = 2 ** depth - 1  # internal nodes per tree
    L = 2 ** depth      # leaves per tree
    NB = 4              # number of bundles (boosting rounds)

    key = jax.random.PRNGKey(0)
    k_x, k_feat, k_thr, k_leaf = jax.random.split(key, 4)

    # Deterministic synthetic tree parameters.
    feat_idx = jax.random.randint(k_feat, (NB, NUM_CLASSES, I), 0, F)
    A = jax.nn.one_hot(feat_idx, F, dtype=jnp.float32)          # [NB, 3, I, F]
    A = jnp.transpose(A, (0, 1, 3, 2))                          # [NB, 3, F, I]
    B = jax.random.uniform(k_thr, (NB, NUM_CLASSES, I),
                           minval=0.2, maxval=0.8).astype(jnp.float32)
    E = jax.random.normal(k_leaf, (NB, NUM_CLASSES, L, 1)).astype(jnp.float32)

    C_np, D_np = build_tree_paths(depth)
    Ct = jnp.asarray(C_np.T)                                    # [I, L]
    D_row = jnp.asarray(D_np)[None, :]                          # [1, L]

    x = jax.random.uniform(k_x, (batch, F), dtype=jnp.float32)

    # Fuse all bundles/classes into the three lane-dense matmul operands.
    A_flat, thr, Ct_big, D_flat, E_pad = build_fused_params(A, B, E, Ct, D_row)

    out = gbt_forward(x, A_flat, thr, Ct_big, D_flat, E_pad)
    out = jax.block_until_ready(out)

    ref = jax.block_until_ready(gbt_reference(x, A, B, E, Ct, D_row))
    np.testing.assert_allclose(np.asarray(out), np.asarray(ref), rtol=1e-5, atol=1e-5)

    print("KERNEL_OK")
</pallas_src>

<mosaic_0001>
module attributes {stable_mosaic.version = 11 : i64} {
  func.func @gbt_kernel(%arg0: i32, %arg1: memref<8x16xf32, #tpu.memory_space<vmem>>, %arg2: memref<16x128xf32, #tpu.memory_space<vmem>>, %arg3: memref<1x128xf32, #tpu.memory_space<vmem>>, %arg4: memref<128x128xf32, #tpu.memory_space<vmem>>, %arg5: memref<1x128xf32, #tpu.memory_space<vmem>>, %arg6: memref<128x128xf32, #tpu.memory_space<vmem>>, %arg7: memref<8x128xf32, #tpu.memory_space<vmem>>) attributes {dimension_semantics = [#tpu.dimension_semantics<parallel>], iteration_bounds = array<i64: 1>, scalar_prefetch = 0 : i64, scratch_operands = 0 : i64, tpu.core_type = #tpu.core_type<tc>, window_params = [{transform_indices = @transform_0, window_bounds = array<i64: 8, 16>}, {pipeline_mode = #tpu.pipeline_mode<synchronous>, transform_indices = @transform_1, window_bounds = array<i64: 16, 128>}, {pipeline_mode = #tpu.pipeline_mode<synchronous>, transform_indices = @transform_2, window_bounds = array<i64: 1, 128>}, {pipeline_mode = #tpu.pipeline_mode<synchronous>, transform_indices = @transform_3, window_bounds = array<i64: 128, 128>}, {pipeline_mode = #tpu.pipeline_mode<synchronous>, transform_indices = @transform_4, window_bounds = array<i64: 1, 128>}, {pipeline_mode = #tpu.pipeline_mode<synchronous>, transform_indices = @transform_5, window_bounds = array<i64: 128, 128>}, {transform_indices = @transform_6, window_bounds = array<i64: 8, 128>}]} {
    %c0 = arith.constant 0 : index
    %c0_0 = arith.constant 0 : index
    %0 = vector.load %arg1[%c0, %c0_0] : memref<8x16xf32, #tpu.memory_space<vmem>>, vector<8x16xf32>
    %c0_1 = arith.constant 0 : index
    %c0_2 = arith.constant 0 : index
    %1 = vector.load %arg2[%c0_1, %c0_2] : memref<16x128xf32, #tpu.memory_space<vmem>>, vector<16x128xf32>
    %cst = arith.constant dense<0.000000e+00> : vector<8x128xf32>
    %2 = tpu.matmul %0, %1, %cst {dimension_numbers = #tpu.dot_dimension_numbers<[1], [0], [0], [1], [0, 0, 1, 1], [], []>} : vector<8x16xf32>, vector<16x128xf32>, vector<8x128xf32> -> vector<8x128xf32>
    %c0_3 = arith.constant 0 : index
    %c0_4 = arith.constant 0 : index
    %3 = vector.load %arg3[%c0_3, %c0_4] : memref<1x128xf32, #tpu.memory_space<vmem>>, vector<1x128xf32>
    %4 = vector.broadcast %3 : vector<1x128xf32> to vector<8x128xf32>
    %5 = arith.cmpf ole, %2, %4 : vector<8x128xf32>
    %6 = arith.extui %5 : vector<8x128xi1> to vector<8x128xi32>
    %7 = arith.sitofp %6 : vector<8x128xi32> to vector<8x128xf32>
    %c0_5 = arith.constant 0 : index
    %c0_6 = arith.constant 0 : index
    %8 = vector.load %arg4[%c0_5, %c0_6] : memref<128x128xf32, #tpu.memory_space<vmem>>, vector<128x128xf32>
    %cst_7 = arith.constant dense<0.000000e+00> : vector<8x128xf32>
    %9 = tpu.matmul %7, %8, %cst_7 {dimension_numbers = #tpu.dot_dimension_numbers<[1], [0], [0], [1], [0, 0, 1, 1], [], []>} : vector<8x128xf32>, vector<128x128xf32>, vector<8x128xf32> -> vector<8x128xf32>
    %c0_8 = arith.constant 0 : index
    %c0_9 = arith.constant 0 : index
    %10 = vector.load %arg5[%c0_8, %c0_9] : memref<1x128xf32, #tpu.memory_space<vmem>>, vector<1x128xf32>
    %cst_10 = arith.constant 5.000000e-01 : f32
    %11 = vector.broadcast %cst_10 : f32 to vector<1x128xf32>
    %12 = arith.subf %10, %11 : vector<1x128xf32>
    %13 = vector.broadcast %12 : vector<1x128xf32> to vector<8x128xf32>
    %14 = arith.cmpf ogt, %9, %13 : vector<8x128xf32>
    %15 = arith.extui %14 : vector<8x128xi1> to vector<8x128xi32>
    %16 = arith.sitofp %15 : vector<8x128xi32> to vector<8x128xf32>
    %c0_11 = arith.constant 0 : index
    %c0_12 = arith.constant 0 : index
    %17 = vector.load %arg6[%c0_11, %c0_12] : memref<128x128xf32, #tpu.memory_space<vmem>>, vector<128x128xf32>
    %cst_13 = arith.constant dense<0.000000e+00> : vector<8x128xf32>
    %18 = tpu.matmul %16, %17, %cst_13 {dimension_numbers = #tpu.dot_dimension_numbers<[1], [0], [0], [1], [0, 0, 1, 1], [], []>} : vector<8x128xf32>, vector<128x128xf32>, vector<8x128xf32> -> vector<8x128xf32>
    %c0_14 = arith.constant 0 : index
    %c0_15 = arith.constant 0 : index
    %19 = vector.load %arg7[%c0_14, %c0_15] : memref<8x128xf32, #tpu.memory_space<vmem>>, vector<8x128xf32>
    tpu.vector_store %arg7[%c0_14, %c0_15], %18 {strides = array<i32>} : memref<8x128xf32, #tpu.memory_space<vmem>>, vector<8x128xf32>,
    return
  }
  func.func @transform_0(%arg0: i32) -> (i32, i32) {
    %c0_i32 = arith.constant 0 : i32
    %c0_i32_0 = arith.constant 0 : i32
    return %arg0, %c0_i32 : i32, i32
  }
  func.func @transform_1(%arg0: i32) -> (i32, i32) {
    %c0_i32 = arith.constant 0 : i32
    %c0_i32_0 = arith.constant 0 : i32
    %c0_i32_1 = arith.constant 0 : i32
    return %c0_i32, %c0_i32_0 : i32, i32
  }
  func.func @transform_2(%arg0: i32) -> (i32, i32) {
    %c0_i32 = arith.constant 0 : i32
    %c0_i32_0 = arith.constant 0 : i32
    %c0_i32_1 = arith.constant 0 : i32
    return %c0_i32, %c0_i32_0 : i32, i32
  }
  func.func @transform_3(%arg0: i32) -> (i32, i32) {
    %c0_i32 = arith.constant 0 : i32
    %c0_i32_0 = arith.constant 0 : i32
    %c0_i32_1 = arith.constant 0 : i32
    return %c0_i32, %c0_i32_0 : i32, i32
  }
  func.func @transform_4(%arg0: i32) -> (i32, i32) {
    %c0_i32 = arith.constant 0 : i32
    %c0_i32_0 = arith.constant 0 : i32
    %c0_i32_1 = arith.constant 0 : i32
    return %c0_i32, %c0_i32_0 : i32, i32
  }
  func.func @transform_5(%arg0: i32) -> (i32, i32) {
    %c0_i32 = arith.constant 0 : i32
    %c0_i32_0 = arith.constant 0 : i32
    %c0_i32_1 = arith.constant 0 : i32
    return %c0_i32, %c0_i32_0 : i32, i32
  }
  func.func @transform_6(%arg0: i32) -> (i32, i32) {
    %c0_i32 = arith.constant 0 : i32
    %c0_i32_0 = arith.constant 0 : i32
    return %arg0, %c0_i32 : i32, i32
  }
}

</mosaic_0001>

<bundles_post_ra>
// kernel: tpu_custom_call.1
= control target key start
LH: loop header
LB: loop body
LE: loop exit
PB: predicated region body
PF: predicated region fallthrough
CT: control target
= control target key end

     0   :  { %11 = vsyncpa [#allocation3], 0  ;;  %s719_s0 = inlined_call_operand.hbm [shape: f32[8,16], index: 0, kind: input, shape index: {}]   ;;  %s720_s1 = inlined_call_operand.hbm [shape: f32[16,128], index: 1, kind: input, shape index: {}]   ;;  %s721_s2 = inlined_call_operand.vmem [shape: f32[1,128], index: 2, kind: input, shape index: {}]   ;;  %s722_s3 = inlined_call_operand.hbm [shape: f32[128,128], index: 3, kind: input, shape index: {}]   ;;  %s723_s4 = inlined_call_operand.vmem [shape: f32[1,128], index: 4, kind: input, shape index: {}]   ;;  %s724_s5 = inlined_call_operand.hbm [shape: f32[128,128], index: 5, kind: input, shape index: {}]   ;;  %s725_s6 = inlined_call_operand.hbm [shape: f32[8,128], index: 6, kind: output, shape index: {}]  }
   0x1   :  { %12 = vsyncpa [#allocation6], 0 }
   0x2   :  { %13 = vsyncpa [#allocation9], 0 }
   0x3   :  { %14 = vsyncpa [#allocation4], 0  ;;  %s604_s21 = smov [#allocation5]  }
   0x4   :  { %s30_s22 = sshll.u32 %s604_s21, 4  ;;  %s31_s22 = int_to_ptr.vmem [resolvable:$true] %s30_s22 }
   0x5   :  { %s504_s23 = scalar_lea.vmem %s31_s22, 256  ;;  %p509_p1 = scmp.lt.s32.totalorder %s31_s22, %s31_s22 }
   0x6   :  { %p505_p0 = scmp.ne.s32.totalorder %s31_s22, %s504_s23  ;;  %p510_p2 = scmp.lt.s32.totalorder %s504_s23, %s504_s23 }
   0x8   :  { %p511_p3 = por %p510_p2, %p509_p1 }
   0xa   :  { %p512_p4 = pnand %p511_p3, %p505_p0 }
   0xc   :  { %515 = shalt.err (!%p512_p4)
}
   0xd   :  { %s605_s24 = smov 128   ;;  %s606_s25 = smov 8  }
   0xe   :  { %36 = dma.hbm_to_vmem [thread:$0]  %s720_s1, 256, %s31_s22, [#allocation6], %s605_s24, %s605_s24, %s606_s25  }
   0xf   :  { %s607_s28 = smov [#allocation2]   ;;  %s608_s30 = smov [#allocation7]  }
  0x10   :  { %s21_s29 = sshll.u32 %s607_s28, 4  ;;  %s44_s7 = sshll.u32 %s608_s30, 4  ;;  %s22_s29 = int_to_ptr.vmem [resolvable:$true] %s21_s29  ;;  %s45_s7 = int_to_ptr.vmem [resolvable:$true] %s44_s7 }
  0x11   :  { %s524_s8 = scalar_lea.vmem %s22_s29, 128  ;;  %p529_p6 = scmp.lt.s32.totalorder %s22_s29, %s22_s29 }
  0x12   :  { %p525_p5 = scmp.ne.s32.totalorder %s22_s29, %s524_s8  ;;  %p530_p7 = scmp.lt.s32.totalorder %s524_s8, %s524_s8 }
  0x14   :  { %p531_p8 = por %p530_p7, %p529_p6 }
  0x16   :  { %p532_p9 = pnand %p531_p8, %p525_p5 }
  0x18   :  { %535 = shalt.err (!%p532_p9)
}
  0x19   :  { %24 = dma.hbm_to_vmem [thread:$0]  %s719_s0, 128, %s22_s29, [#allocation3]  }
  0x1a   :  { %s544_s11 = scalar_lea.vmem %s45_s7, 2048  ;;  %p549_p11 = scmp.lt.s32.totalorder %s45_s7, %s45_s7 }
  0x1b   :  { %p545_p10 = scmp.ne.s32.totalorder %s45_s7, %s544_s11  ;;  %p550_p12 = scmp.lt.s32.totalorder %s544_s11, %s544_s11 }
  0x1d   :  { %p551_p13 = por %p550_p12, %p549_p11 }
  0x1f   :  { %p552_p0 = pnand %p551_p13, %p545_p10 }
  0x21   :  { %555 = shalt.err (!%p552_p0)
}
  0x22   :  { %50 = dma.hbm_to_vmem [thread:$0]  %s722_s3, 2048, %s45_s7, [#allocation6], %s605_s24, %s605_s24, %s606_s25  }
  0x23   :  { %s609_s13 = smov [#allocation8]  }
  0x24   :  { %s58_s14 = sshll.u32 %s609_s13, 4  ;;  %s59_s14 = int_to_ptr.vmem [resolvable:$true] %s58_s14 }
  0x25   :  { %s564_s15 = scalar_lea.vmem %s59_s14, 2048  ;;  %p569_p2 = scmp.lt.s32.totalorder %s59_s14, %s59_s14 }
  0x26   :  { %p565_p1 = scmp.ne.s32.totalorder %s59_s14, %s564_s15  ;;  %p570_p3 = scmp.lt.s32.totalorder %s564_s15, %s564_s15 }
  0x28   :  { %p571_p4 = por %p570_p3, %p569_p2 }
  0x2a   :  { %p572_p5 = pnand %p571_p4, %p565_p1 }
  0x2c   :  { %575 = shalt.err (!%p572_p5)
}
  0x2d   :  { %64 = dma.hbm_to_vmem [thread:$0]  %s724_s5, 2048, %s59_s14, [#allocation9], %s605_s24, %s605_s24, %s606_s25  }
  0x2e   :  { %596 = dma.done.wait [#allocation3], 128  }
  0x2f   :  { %597 = vsyncadd [#allocation3], 4294967168 }
  0x30   :  { %598 = dma.done.wait [#allocation6], 2304  }
  0x31   :  { %599 = vsyncadd [#allocation6], 4294964992 }
  0x32   :  { %600 = dma.done.wait [#allocation9], 2048  }
  0x33   :  { %601 = vsyncadd [#allocation9], 4294965248  ;;  %v610_v0 = vmov 0.0   ;;  %vm611_vm0 = vmmov 0   ;;  %v79_v1 = vld [vmem:[#allocation5 + $0x8] sm:$0xff]  ;;  %v78_v2 = vld [vmem:[#allocation5] sm:$0xff]  ;;  %v253_v40 = vlaneseq }
  0x34   :  { %409 = vmatprep.subr.mxu0 %v610_v0  ;;  %413 = vmatprep.mubr.msk.f32.mxu0 %vm611_vm0, %v610_v0  ;;  %v77_v3 = vld [vmem:[#allocation2] sm:$0xff]  ;;  %vm80_vm1 = vcmask 130048   ;;  %v179_v4 = vld [vmem:[#allocation7 + $0x78] sm:$0xff]  ;;  %v178_v5 = vld [vmem:[#allocation7 + $0x70] sm:$0xff]  ;;  %v612_v38 = vmov 1.0  }
  0x35   :  { %416 = vmatprep.subr.mxu1 %v610_v0  ;;  %448 = vmatprep.mubr.msk.f32.mxu1 %vm611_vm0, %v610_v0  ;;  %v177_v6 = vld [vmem:[#allocation7 + $0x68] sm:$0xff]  ;;  %v176_v7 = vld [vmem:[#allocation7 + $0x60] sm:$0xff]  ;;  %v175_v8 = vld [vmem:[#allocation7 + $0x58] sm:$0xff]  ;;  %v254_v41 = vshrl.u32 %v253_v40, 7 }
  0x36   :  { %410 = vmatpush3.msra.mxu0 %v79_v1  ;;  %417 = vmatpush3.msra.mxu1 %v179_v4  ;;  %v174_v9 = vld [vmem:[#allocation7 + $0x50] sm:$0xff]  ;;  %v173_v10 = vld [vmem:[#allocation7 + $0x48] sm:$0xff]  ;;  %v172_v11 = vld [vmem:[#allocation7 + $0x40] sm:$0xff] }
  0x37   :  { %411 = vmatprep.subr.mxu0 %v610_v0  ;;  %418 = vmatprep.subr.mxu1 %v610_v0  ;;  %v171_v12 = vld [vmem:[#allocation7 + $0x38] sm:$0xff]  ;;  %v170_v13 = vld [vmem:[#allocation7 + $0x30] sm:$0xff]  ;;  %v169_v14 = vld [vmem:[#allocation7 + $0x28] sm:$0xff]  ;;  %v255_v44 = vsub.s32 0, %v254_v41 }
  0x38   :  { %412 = vmatpush3.msra.mxu0 %v78_v2  ;;  %419 = vmatpush3.msra.mxu1 %v178_v5  ;;  %v168_v15 = vld [vmem:[#allocation7 + $0x20] sm:$0xff]  ;;  %v167_v16 = vld [vmem:[#allocation7 + $0x18] sm:$0xff]  ;;  %v166_v17 = vld [vmem:[#allocation7 + $0x10] sm:$0xff] }
  0x39   :  { %414 = vmatmul.mubr.msk.f32.vlgmr.msra.gmra.mxu0 %vm80_vm1, %v77_v3  ;;  %420 = vmatprep.subr.mxu1 %v610_v0  ;;  %v165_v18 = vld [vmem:[#allocation7 + $0x8] sm:$0xff]  ;;  %v164_v19 = vld [vmem:[#allocation7] sm:$0xff]  ;;  %v276_v20 = vld [vmem:[#allocation8 + $0x78] sm:$0xff] }
  0x3a   :  { %451 = vmatprep.subr.mxu0 %v610_v0  ;;  %421 = vmatpush3.msra.mxu1 %v177_v6  ;;  %v275_v21 = vld [vmem:[#allocation8 + $0x70] sm:$0xff]  ;;  %v274_v22 = vld [vmem:[#allocation8 + $0x68] sm:$0xff]  ;;  %v273_v23 = vld [vmem:[#allocation8 + $0x60] sm:$0xff] }
  0x3b   :  { %483 = vmatprep.mubr.msk.f32.mxu0 %vm611_vm0, %v610_v0  ;;  %422 = vmatprep.subr.mxu1 %v610_v0  ;;  %v272_v24 = vld [vmem:[#allocation8 + $0x58] sm:$0xff]  ;;  %v271_v25 = vld [vmem:[#allocation8 + $0x50] sm:$0xff]  ;;  %v270_v26 = vld [vmem:[#allocation8 + $0x48] sm:$0xff] }
  0x3c   :  { %423 = vmatpush3.msra.mxu1 %v176_v7  ;;  %452 = vmatpush3.msra.mxu0 %v276_v20  ;;  %v269_v27 = vld [vmem:[#allocation8 + $0x40] sm:$0xff]  ;;  %v268_v28 = vld [vmem:[#allocation8 + $0x38] sm:$0xff]  ;;  %v267_v29 = vld [vmem:[#allocation8 + $0x30] sm:$0xff] }
  0x3d   :  { %424 = vmatprep.subr.mxu1 %v610_v0  ;;  %453 = vmatprep.subr.mxu0 %v610_v0  ;;  %v266_v30 = vld [vmem:[#allocation8 + $0x28] sm:$0xff]  ;;  %v265_v31 = vld [vmem:[#allocation8 + $0x20] sm:$0xff]  ;;  %v264_v32 = vld [vmem:[#allocation8 + $0x18] sm:$0xff] }
  0x3e   :  { %425 = vmatpush3.msra.mxu1 %v175_v8  ;;  %454 = vmatpush3.msra.mxu0 %v275_v21  ;;  %v263_v33 = vld [vmem:[#allocation8 + $0x10] sm:$0xff]  ;;  %v262_v34 = vld [vmem:[#allocation8 + $0x8] sm:$0xff]  ;;  %v261_v39 = vld [vmem:[#allocation8] sm:$0xff] }
  0x3f   :  { %426 = vmatprep.subr.mxu1 %v610_v0  ;;  %455 = vmatprep.subr.mxu0 %v610_v0  ;;  %v366_v35 = vld [vmem:[%s721_s2] ss:$0 sm:$0xff]  ;;  %s613_s2 = smov [#allocation10]  }
  0x40   :  { %427 = vmatpush3.msra.mxu1 %v174_v9  ;;  %456 = vmatpush3.msra.mxu0 %v274_v22  ;;  %v250_v42 = vld [vmem:[%s723_s4] sm:$0x1]  ;;  %s354_s19 = sshll.u32 %s613_s2, 4  ;;  %s355_s19 = int_to_ptr.vmem [resolvable:$true] %s354_s19 }
  0x41   :  { %428 = vmatprep.subr.mxu1 %v610_v0  ;;  %457 = vmatprep.subr.mxu0 %v610_v0  ;;  %v369_v43 = vadd.f32 -0.5, %v250_v42  ;;  %s576_s20 = scalar_lea.vmem %s355_s19, 128  ;;  %p581_p7 = scmp.lt.s32.totalorder %s355_s19, %s355_s19 }
  0x42   :  { %429 = vmatpush3.msra.mxu1 %v173_v10  ;;  %458 = vmatpush3.msra.mxu0 %v273_v23  ;;  %p577_p6 = scmp.ne.s32.totalorder %s355_s19, %s576_s20  ;;  %p582_p8 = scmp.lt.s32.totalorder %s576_s20, %s576_s20 }
  0x43   :  { %430 = vmatprep.subr.mxu1 %v610_v0  ;;  %459 = vmatprep.subr.mxu0 %v610_v0  ;;  %v256_v45 = vrot.slane %v369_v43, %v255_v44 }
  0x44   :  { %431 = vmatpush3.msra.mxu1 %v172_v11  ;;  %460 = vmatpush3.msra.mxu0 %v272_v24  ;;  %p583_p9 = por %p582_p8, %p581_p7 }
  0x45   :  { %432 = vmatprep.subr.mxu1 %v610_v0  ;;  %461 = vmatprep.subr.mxu0 %v610_v0 }
  0x46   :  { %433 = vmatpush3.msra.mxu1 %v171_v12  ;;  %462 = vmatpush3.msra.mxu0 %v271_v25  ;;  %p584_p10 = pnand %p583_p9, %p577_p6 }
  0x47   :  { %434 = vmatprep.subr.mxu1 %v610_v0  ;;  %463 = vmatprep.subr.mxu0 %v610_v0 }
  0x48   :  { %435 = vmatpush3.msra.mxu1 %v170_v13  ;;  %464 = vmatpush3.msra.mxu0 %v270_v26 }
  0x49   :  { %436 = vmatprep.subr.mxu1 %v610_v0  ;;  %465 = vmatprep.subr.mxu0 %v610_v0 }
  0x4a   :  { %437 = vmatpush3.msra.mxu1 %v169_v14  ;;  %466 = vmatpush3.msra.mxu0 %v269_v27 }
  0x4b   :  { %438 = vmatprep.subr.mxu1 %v610_v0  ;;  %467 = vmatprep.subr.mxu0 %v610_v0 }
  0x4c   :  { %439 = vmatpush3.msra.mxu1 %v168_v15  ;;  %468 = vmatpush3.msra.mxu0 %v268_v28 }
  0x4d   :  { %440 = vmatprep.subr.mxu1 %v610_v0  ;;  %469 = vmatprep.subr.mxu0 %v610_v0 }
  0x4e   :  { %441 = vmatpush3.msra.mxu1 %v167_v16  ;;  %470 = vmatpush3.msra.mxu0 %v267_v29 }
  0x4f   :  { %442 = vmatprep.subr.mxu1 %v610_v0  ;;  %471 = vmatprep.subr.mxu0 %v610_v0 }
  0x50   :  { %443 = vmatpush3.msra.mxu1 %v166_v17  ;;  %472 = vmatpush3.msra.mxu0 %v266_v30 }
  0x51   :  { %444 = vmatprep.subr.mxu1 %v610_v0  ;;  %473 = vmatprep.subr.mxu0 %v610_v0 }
  0x52   :  { %445 = vmatpush3.msra.mxu1 %v165_v18  ;;  %474 = vmatpush3.msra.mxu0 %v265_v31 }
  0x53   :  { %446 = vmatprep.subr.mxu1 %v610_v0  ;;  %475 = vmatprep.subr.mxu0 %v610_v0 }
  0x54   :  { %447 = vmatpush3.msra.mxu1 %v164_v19  ;;  %476 = vmatpush3.msra.mxu0 %v264_v32 }
  0x55   :  { %477 = vmatprep.subr.mxu0 %v610_v0 }
  0x56   :  { %478 = vmatpush3.msra.mxu0 %v263_v33 }
  0x57   :  { %479 = vmatprep.subr.mxu0 %v610_v0 }
  0x58   :  { %480 = vmatpush3.msra.mxu0 %v262_v34 }
  0x59   :  { %481 = vmatprep.subr.mxu0 %v610_v0 }
  0x5a   :  { %482 = vmatpush3.msra.mxu0 %v261_v39 }
  0xf9   :  { %v150_v36 = vpop.f32.mrf.mxu0 }
  0xfa   :  { %vm161_vm2 = vcmp.le.f32.partialorder %v150_v36, %v366_v35 }
  0xfb   :  { %v415_v37 = vpop.f32.mrf.mxu0  ;;  %449 = vmatmul.mubr.msk.f32.vlgmr.msra.gmra.mxu1 %vm161_vm2, %v612_v38 }
 0x1bb   :  { %v246_v46 = vpop.f32.mrf.mxu1 }
 0x1bc   :  { %vm258_vm3 = vcmp.gt.f32.partialorder %v246_v46, %v256_v45 }
 0x1bd   :  { %v450_v47 = vpop.f32.mrf.mxu1  ;;  %484 = vmatmul.mubr.msk.f32.vlgmr.msra.gmra.mxu0 %vm258_vm3, %v612_v38 }
 0x27d   :  { %v343_v48 = vpop.f32.mrf.mxu0 }
 0x27e   :  { %347 = vst [vmem:[#allocation10] sm:$0xff] %v343_v48 }
 0x27f   :  { %v485_v49 = vpop.f32.mrf.mxu0 }
 0x280   :  { %587 = shalt.err (!%p584_p10)
}
 0x281   :  { %357 = dma.vmem_to_hbm [thread:$0]  %s355_s19, 128, %s725_s6, [#allocation4]  }
 0x282   :  { %602 = dma.done.wait [#allocation4], 128  }
 0x283   :  { %603 = vsyncadd [#allocation4], 4294967168 }
 0x284   :  { %361 = vsyncpa [#allocation3], 1 }
 0x285   :  { %362 = vsyncpa [#allocation6], 1 }
 0x286   :  { %363 = vsyncpa [#allocation9], 1 }
 0x287   :  { %364 = vsyncpa [#allocation4], 1 }

</bundles_post_ra>
